<compile_context>
chip_gen: v7x
topology: tpu7x:2x2x1
jax: 0.10.0
libtpu: 0.0.40
codegen_flags: <defaults>
</compile_context>

<pallas_src>
import functools

import jax
import jax.numpy as jnp
from jax.experimental import pallas as pl
from jax.experimental.pallas import tpu as pltpu


def _round_up(x, m):
    return ((x + m - 1) // m) * m


def _attention_module4_kernel(vx_ref, ax_ref, w1v_ref, w1a_ref, b1_ref,
                              w2_ref, b2_ref, vx_att_ref, ax_att_ref):
    """One batch tile of AttentionModule4.forward (eval mode)."""
    f32 = jnp.float32
    vx = vx_ref[...]                           # (TB, 128)
    ax = ax_ref[...]                           # (TB, 128)
    wdtype = w1v_ref.dtype

    # Stage 1: all four fc1 layers in one logical MXU pass; the lane-concat of
    # [vx|ax] is replaced by two accumulating K=128 matmuls (same FLOPs, no
    # (TB,256) VMEM copy).  Dropout = identity in eval mode.
    h = jnp.dot(vx.astype(wdtype), w1v_ref[...], preferred_element_type=f32)
    h = h + jnp.dot(ax.astype(wdtype), w1a_ref[...], preferred_element_type=f32)
    h = jnp.maximum(h + b1_ref[...], 0.0)                            # (TB, 512)

    # Stage 2: block-diagonal fc2 -> the four (TB,32) unit outputs emerge
    # already lane-concatenated as one lane-dense (TB,128) slab.
    concat = jnp.dot(h.astype(wdtype), w2_ref[...],
                     preferred_element_type=f32) + b2_ref[...]       # (TB, 128)

    vx_att_ref[...] = (vx.astype(f32) + concat).astype(vx_att_ref.dtype)
    ax_att_ref[...] = (ax.astype(f32) + concat).astype(ax_att_ref.dtype)


def attention_module4_forward(vx, ax, params, *, block_b=None, act_buffers=None):
    """AttentionModule4 forward.

    vx, ax: (B, feature_dim) arrays (f32 or bf16; dtype is preserved on output).
    params: packed dict from make_params().
    Returns (vx_att, ax_att), both (B, feature_dim) in the input dtype.
    """
    assert vx.shape == ax.shape and vx.dtype == ax.dtype
    B, D = vx.shape
    w1v, w1a, b1 = params["w1v"], params["w1a"], params["b1"]
    w2, b2 = params["w2"], params["b2"]
    H = w1v.shape[1]                          # num_sub * feature_dim
    assert w1v.shape == (D, H) and w1a.shape == (D, H) and w2.shape == (H, D)
    assert b1.shape == (1, H) and b2.shape == (1, D)

    act_dtype = vx.dtype
    elt = jnp.dtype(act_dtype).itemsize
    welt = jnp.dtype(w1v.dtype).itemsize
    row_mult = 8 * (4 // elt)                 # f32 -> 8 rows, bf16 -> 16 rows

    # --- Batch tiling heuristic ------------------------------------------------
    # Aim for >=4 grid steps (v7x megacore sharding + activation-DMA pipelining)
    # while keeping tiles >=256 rows so the ~0.35 us/step overhead is amortized,
    # capped at 2048 rows to bound VMEM footprint.
    if block_b is None:
        target = max(pl.cdiv(B, 4), 256)
        block_b = _round_up(min(min(target, 2048), B), row_mult)
    else:
        block_b = _round_up(block_b, row_mult)

    # Ragged batches: pad to a whole number of tiles, slice the result back.
    B_pad = _round_up(max(B, block_b), block_b)
    if B_pad != B:
        pad = ((0, B_pad - B), (0, 0))
        vx_p, ax_p = jnp.pad(vx, pad), jnp.pad(ax, pad)
    else:
        vx_p, ax_p = vx, ax
    grid = (B_pad // block_b,)

    # --- Specs ------------------------------------------------------------------
    def _act_spec():
        if act_buffers is None:
            return pl.BlockSpec((block_b, D), lambda i: (i, 0))
        return pl.BlockSpec((block_b, D), lambda i: (i, 0),
                            pipeline_mode=pl.Buffered(act_buffers))

    def _w_spec(shape):
        return pl.BlockSpec(shape, lambda i: (0, 0))   # resident across the grid

    # --- VMEM budget (explicit limit: v5e default scoped VMEM is only 16 MiB;
    #     keep headroom under v7x's 64 MiB physical VMEM) ------------------------
    n_buf = 2 if act_buffers is None else act_buffers
    act_bytes = 4 * n_buf * block_b * D * elt            # 2 in + 2 out tiles
    inter_bytes = block_b * (H + D) * 4                  # h + concat in f32
    w_bytes = (2 * D * H + H * D) * welt + (H + D) * 4   # resident weights/biases
    vmem_limit = int(1.5 * (act_bytes + inter_bytes + w_bytes)) + (4 << 20)
    vmem_limit = min(max(vmem_limit, 16 << 20), 48 << 20)

    # --- Advisory cost estimate ---------------------------------------------------
    cost = pl.CostEstimate(
        flops=2 * B_pad * (2 * D * H + H * D),
        transcendentals=0,
        bytes_accessed=4 * B_pad * D * elt + (2 * D * H + H * D) * welt
        + (H + D) * 4,
    )

    out_shape = (
        jax.ShapeDtypeStruct((B_pad, D), act_dtype),     # vx_att
        jax.ShapeDtypeStruct((B_pad, D), act_dtype),     # ax_att
    )

    fn = pl.pallas_call(
        _attention_module4_kernel,
        out_shape=out_shape,
        grid=grid,
        in_specs=[_act_spec(), _act_spec(),
                  _w_spec(w1v.shape), _w_spec(w1a.shape), _w_spec(b1.shape),
                  _w_spec(w2.shape), _w_spec(b2.shape)],
        out_specs=(_act_spec(), _act_spec()),
        compiler_params=pltpu.CompilerParams(
            dimension_semantics=("parallel",),
            vmem_limit_bytes=vmem_limit),
        cost_estimate=cost,
    )
    vx_att, ax_att = fn(vx_p, ax_p, w1v, w1a, b1, w2, b2)
    if B_pad != B:
        vx_att, ax_att = vx_att[:B], ax_att[:B]
    return vx_att, ax_att


def _linear_init(key, fan_in, fan_out):
    """PyTorch nn.Linear default init, stored transposed as (in, out)."""
    kw, kb = jax.random.split(key)
    bound = 1.0 / jnp.sqrt(jnp.float32(fan_in))
    w = jax.random.uniform(kw, (fan_in, fan_out), jnp.float32, -bound, bound)
    b = jax.random.uniform(kb, (fan_out,), jnp.float32, -bound, bound)
    return w, b


def make_params(key, feature_dim=128, num_sub=4, use_bf16=True):
    """Per-unit f32 params (for the reference) + packed kernel buffers."""
    out_dim = feature_dim // num_sub
    keys = jax.random.split(key, 2 * num_sub)
    units = []
    for n in range(num_sub):
        w1, b1 = _linear_init(keys[2 * n], 2 * feature_dim, feature_dim)
        w2, b2 = _linear_init(keys[2 * n + 1], feature_dim, out_dim)
        units.append((w1, b1, w2, b2))

    # fc1 weights packed side-by-side (shared [vx|ax] input), then split
    # row-wise into the vx-half and ax-half so the kernel never concatenates.
    W1 = jnp.concatenate([u[0] for u in units], axis=1)            # (2D, ns*D)
    W1v, W1a = W1[:feature_dim], W1[feature_dim:]                  # (D, ns*D) x2
    B1 = jnp.concatenate([u[1] for u in units], axis=0)[None, :]   # (1, ns*D)
    # fc2 weights block-diagonal: the 4 unit outputs emerge pre-concatenated.
    W2 = jnp.zeros((num_sub * feature_dim, feature_dim), jnp.float32)
    for n, (_, _, w2, _) in enumerate(units):
        W2 = W2.at[n * feature_dim:(n + 1) * feature_dim,
                   n * out_dim:(n + 1) * out_dim].set(w2)
    B2 = jnp.concatenate([u[3] for u in units], axis=0)[None, :]   # (1, D)

    wdtype = jnp.bfloat16 if use_bf16 else jnp.float32
    packed = {"w1v": W1v.astype(wdtype), "w1a": W1a.astype(wdtype), "b1": B1,
              "w2": W2.astype(wdtype), "b2": B2}
    return packed, units


def reference_forward(vx, ax, units):
    """Pure-JAX reference matching AttentionModule4.forward in eval mode (f32)."""
    vx32, ax32 = vx.astype(jnp.float32), ax.astype(jnp.float32)
    x = jnp.concatenate([vx32, ax32], axis=-1)
    outs = []
    for (w1, b1, w2, b2) in units:
        h = jnp.maximum(x @ w1 + b1, 0.0)
        outs.append(h @ w2 + b2)
    concat = jnp.concatenate(outs, axis=1)
    return vx32 + concat, ax32 + concat


if __name__ == "__main__":
    key = jax.random.PRNGKey(0)
    k_vx, k_ax, k_p = jax.random.split(key, 3)

    B, D = 8, 128                            # feature_dim=128 as in the module
    vx = jax.random.normal(k_vx, (B, D), jnp.float32)
    ax = jax.random.normal(k_ax, (B, D), jnp.float32)

    # --- Case 1: f32 weights + f32 activations (tight tolerance) -----------------
    packed_f32, units = make_params(k_p, feature_dim=D, num_sub=4, use_bf16=False)
    fwd_f32 = jax.jit(functools.partial(attention_module4_forward,
                                        params=packed_f32))
    vx_att, ax_att = jax.block_until_ready(fwd_f32(vx, ax))
    ref_v, ref_a = reference_forward(vx, ax, units)
    assert vx_att.shape == (B, D) and ax_att.shape == (B, D)
    assert bool(jnp.all(jnp.isfinite(vx_att))) and bool(jnp.all(jnp.isfinite(ax_att)))
    assert bool(jnp.allclose(vx_att, ref_v, atol=1e-4, rtol=1e-4))
    assert bool(jnp.allclose(ax_att, ref_a, atol=1e-4, rtol=1e-4))

    # --- Case 2: bf16 weights + bf16 activations, ragged batch (pad path) --------
    packed_bf16, _ = make_params(k_p, feature_dim=D, num_sub=4, use_bf16=True)
    Br = 10                                  # not a multiple of the 16-row bf16 tile
    vx_r = jax.random.normal(k_vx, (Br, D), jnp.float32)
    ax_r = jax.random.normal(k_ax, (Br, D), jnp.float32)
    fwd_bf16 = jax.jit(functools.partial(attention_module4_forward,
                                         params=packed_bf16))
    vxb, axb = jax.block_until_ready(
        fwd_bf16(vx_r.astype(jnp.bfloat16), ax_r.astype(jnp.bfloat16)))
    ref_vr, ref_ar = reference_forward(vx_r, ax_r, units)
    assert vxb.shape == (Br, D) and vxb.dtype == jnp.bfloat16
    assert bool(jnp.all(jnp.isfinite(vxb.astype(jnp.float32))))
    assert bool(jnp.allclose(vxb.astype(jnp.float32), ref_vr, atol=2e-1, rtol=5e-2))
    assert bool(jnp.allclose(axb.astype(jnp.float32), ref_ar, atol=2e-1, rtol=5e-2))

    print("KERNEL_OK")
</pallas_src>

<mosaic_0001>
module attributes {stable_mosaic.version = 11 : i64} {
  func.func @_attention_module4_kernel(%arg0: i32, %arg1: memref<8x128xf32, #tpu.memory_space<vmem>>, %arg2: memref<8x128xf32, #tpu.memory_space<vmem>>, %arg3: memref<128x512xf32, #tpu.memory_space<vmem>>, %arg4: memref<128x512xf32, #tpu.memory_space<vmem>>, %arg5: memref<1x512xf32, #tpu.memory_space<vmem>>, %arg6: memref<512x128xf32, #tpu.memory_space<vmem>>, %arg7: memref<1x128xf32, #tpu.memory_space<vmem>>, %arg8: memref<8x128xf32, #tpu.memory_space<vmem>>, %arg9: memref<8x128xf32, #tpu.memory_space<vmem>>) attributes {dimension_semantics = [#tpu.dimension_semantics<parallel>], iteration_bounds = array<i64: 1>, scalar_prefetch = 0 : i64, scratch_operands = 0 : i64, tpu.core_type = #tpu.core_type<tc>, window_params = [{transform_indices = @transform_0, window_bounds = array<i64: 8, 128>}, {transform_indices = @transform_1, window_bounds = array<i64: 8, 128>}, {pipeline_mode = #tpu.pipeline_mode<synchronous>, transform_indices = @transform_2, window_bounds = array<i64: 128, 512>}, {pipeline_mode = #tpu.pipeline_mode<synchronous>, transform_indices = @transform_3, window_bounds = array<i64: 128, 512>}, {pipeline_mode = #tpu.pipeline_mode<synchronous>, transform_indices = @transform_4, window_bounds = array<i64: 1, 512>}, {pipeline_mode = #tpu.pipeline_mode<synchronous>, transform_indices = @transform_5, window_bounds = array<i64: 512, 128>}, {pipeline_mode = #tpu.pipeline_mode<synchronous>, transform_indices = @transform_6, window_bounds = array<i64: 1, 128>}, {transform_indices = @transform_7, window_bounds = array<i64: 8, 128>}, {transform_indices = @transform_8, window_bounds = array<i64: 8, 128>}]} {
    %c0 = arith.constant 0 : index
    %c0_0 = arith.constant 0 : index
    %0 = vector.load %arg1[%c0, %c0_0] : memref<8x128xf32, #tpu.memory_space<vmem>>, vector<8x128xf32>
    %c0_1 = arith.constant 0 : index
    %c0_2 = arith.constant 0 : index
    %1 = vector.load %arg2[%c0_1, %c0_2] : memref<8x128xf32, #tpu.memory_space<vmem>>, vector<8x128xf32>
    %c0_3 = arith.constant 0 : index
    %c0_4 = arith.constant 0 : index
    %2 = vector.load %arg3[%c0_3, %c0_4] : memref<128x512xf32, #tpu.memory_space<vmem>>, vector<128x512xf32>
    %cst = arith.constant dense<0.000000e+00> : vector<8x512xf32>
    %3 = tpu.matmul %0, %2, %cst {dimension_numbers = #tpu.dot_dimension_numbers<[1], [0], [0], [1], [0, 0, 1, 1], [], []>} : vector<8x128xf32>, vector<128x512xf32>, vector<8x512xf32> -> vector<8x512xf32>
    %c0_5 = arith.constant 0 : index
    %c0_6 = arith.constant 0 : index
    %4 = vector.load %arg4[%c0_5, %c0_6] : memref<128x512xf32, #tpu.memory_space<vmem>>, vector<128x512xf32>
    %cst_7 = arith.constant dense<0.000000e+00> : vector<8x512xf32>
    %5 = tpu.matmul %1, %4, %cst_7 {dimension_numbers = #tpu.dot_dimension_numbers<[1], [0], [0], [1], [0, 0, 1, 1], [], []>} : vector<8x128xf32>, vector<128x512xf32>, vector<8x512xf32> -> vector<8x512xf32>
    %6 = arith.addf %3, %5 : vector<8x512xf32>
    %c0_8 = arith.constant 0 : index
    %c0_9 = arith.constant 0 : index
    %7 = vector.load %arg5[%c0_8, %c0_9] : memref<1x512xf32, #tpu.memory_space<vmem>>, vector<1x512xf32>
    %8 = vector.broadcast %7 : vector<1x512xf32> to vector<8x512xf32>
    %9 = arith.addf %6, %8 : vector<8x512xf32>
    %cst_10 = arith.constant 0.000000e+00 : f32
    %10 = vector.broadcast %cst_10 : f32 to vector<8x512xf32>
    %11 = arith.maximumf %9, %10 : vector<8x512xf32>
    %c0_11 = arith.constant 0 : index
    %c0_12 = arith.constant 0 : index
    %12 = vector.load %arg6[%c0_11, %c0_12] : memref<512x128xf32, #tpu.memory_space<vmem>>, vector<512x128xf32>
    %cst_13 = arith.constant dense<0.000000e+00> : vector<8x128xf32>
    %13 = tpu.matmul %11, %12, %cst_13 {dimension_numbers = #tpu.dot_dimension_numbers<[1], [0], [0], [1], [0, 0, 1, 1], [], []>} : vector<8x512xf32>, vector<512x128xf32>, vector<8x128xf32> -> vector<8x128xf32>
    %c0_14 = arith.constant 0 : index
    %c0_15 = arith.constant 0 : index
    %14 = vector.load %arg7[%c0_14, %c0_15] : memref<1x128xf32, #tpu.memory_space<vmem>>, vector<1x128xf32>
    %15 = vector.broadcast %14 : vector<1x128xf32> to vector<8x128xf32>
    %16 = arith.addf %13, %15 : vector<8x128xf32>
    %17 = arith.addf %0, %16 : vector<8x128xf32>
    %c0_16 = arith.constant 0 : index
    %c0_17 = arith.constant 0 : index
    %18 = vector.load %arg8[%c0_16, %c0_17] : memref<8x128xf32, #tpu.memory_space<vmem>>, vector<8x128xf32>
    tpu.vector_store %arg8[%c0_16, %c0_17], %17 {strides = array<i32>} : memref<8x128xf32, #tpu.memory_space<vmem>>, vector<8x128xf32>,
    %19 = arith.addf %1, %16 : vector<8x128xf32>
    %c0_18 = arith.constant 0 : index
    %c0_19 = arith.constant 0 : index
    %20 = vector.load %arg9[%c0_18, %c0_19] : memref<8x128xf32, #tpu.memory_space<vmem>>, vector<8x128xf32>
    tpu.vector_store %arg9[%c0_18, %c0_19], %19 {strides = array<i32>} : memref<8x128xf32, #tpu.memory_space<vmem>>, vector<8x128xf32>,
    return
  }
  func.func @transform_0(%arg0: i32) -> (i32, i32) {
    %c0_i32 = arith.constant 0 : i32
    %c0_i32_0 = arith.constant 0 : i32
    return %arg0, %c0_i32 : i32, i32
  }
  func.func @transform_1(%arg0: i32) -> (i32, i32) {
    %c0_i32 = arith.constant 0 : i32
    %c0_i32_0 = arith.constant 0 : i32
    return %arg0, %c0_i32 : i32, i32
  }
  func.func @transform_2(%arg0: i32) -> (i32, i32) {
    %c0_i32 = arith.constant 0 : i32
    %c0_i32_0 = arith.constant 0 : i32
    %c0_i32_1 = arith.constant 0 : i32
    return %c0_i32, %c0_i32_0 : i32, i32
  }
  func.func @transform_3(%arg0: i32) -> (i32, i32) {
    %c0_i32 = arith.constant 0 : i32
    %c0_i32_0 = arith.constant 0 : i32
    %c0_i32_1 = arith.constant 0 : i32
    return %c0_i32, %c0_i32_0 : i32, i32
  }
  func.func @transform_4(%arg0: i32) -> (i32, i32) {
    %c0_i32 = arith.constant 0 : i32
    %c0_i32_0 = arith.constant 0 : i32
    %c0_i32_1 = arith.constant 0 : i32
    return %c0_i32, %c0_i32_0 : i32, i32
  }
  func.func @transform_5(%arg0: i32) -> (i32, i32) {
    %c0_i32 = arith.constant 0 : i32
    %c0_i32_0 = arith.constant 0 : i32
    %c0_i32_1 = arith.constant 0 : i32
    return %c0_i32, %c0_i32_0 : i32, i32
  }
  func.func @transform_6(%arg0: i32) -> (i32, i32) {
    %c0_i32 = arith.constant 0 : i32
    %c0_i32_0 = arith.constant 0 : i32
    %c0_i32_1 = arith.constant 0 : i32
    return %c0_i32, %c0_i32_0 : i32, i32
  }
  func.func @transform_7(%arg0: i32) -> (i32, i32) {
    %c0_i32 = arith.constant 0 : i32
    %c0_i32_0 = arith.constant 0 : i32
    return %arg0, %c0_i32 : i32, i32
  }
  func.func @transform_8(%arg0: i32) -> (i32, i32) {
    %c0_i32 = arith.constant 0 : i32
    %c0_i32_0 = arith.constant 0 : i32
    return %arg0, %c0_i32 : i32, i32
  }
}

</mosaic_0001>

<bundles_post_ra>
// kernel: attention_module4_forward.1
= control target key start
LH: loop header
LB: loop body
LE: loop exit
PB: predicated region body
PF: predicated region fallthrough
CT: control target
= control target key end

     0   :  { %14 = vsyncpa [#allocation3], 0  ;;  %s1394_s0 = inlined_call_operand.hbm [shape: f32[8,128], index: 0, kind: input, shape index: {}]   ;;  %s1395_s1 = inlined_call_operand.hbm [shape: f32[8,128], index: 1, kind: input, shape index: {}]   ;;  %s1396_s2 = inlined_call_operand.hbm [shape: f32[128,512], index: 2, kind: input, shape index: {}]   ;;  %s1397_s3 = inlined_call_operand.hbm [shape: f32[128,512], index: 3, kind: input, shape index: {}]   ;;  %s1398_s4 = inlined_call_operand.vmem [shape: f32[1,512], index: 4, kind: input, shape index: {}]   ;;  %s1399_s5 = inlined_call_operand.hbm [shape: f32[512,128], index: 5, kind: input, shape index: {}]   ;;  %s1400_s6 = inlined_call_operand.vmem [shape: f32[1,128], index: 6, kind: input, shape index: {}]   ;;  %s1401_s7 = inlined_call_operand.hbm [shape: f32[8,128], index: 7, kind: output, shape index: {0}]   ;;  %s1402_s8 = inlined_call_operand.hbm [shape: f32[8,128], index: 8, kind: output, shape index: {1}]  }
   0x1   :  { %15 = vsyncpa [#allocation6], 0 }
   0x2   :  { %16 = vsyncpa [#allocation9], 0 }
   0x3   :  { %17 = vsyncpa [#allocation4], 0 }
   0x4   :  { %18 = vsyncpa [#allocation13], 0  ;;  %s1227_s27 = smov [#allocation5]   ;;  %s1063_s9 = scalar_lea.hbm %s1395_s1, 128 }
   0x5   :  { %s35_s28 = sshll.u32 %s1227_s27, 4  ;;  %p1064_p0 = scmp.ne.s32.totalorder %s1395_s1, %s1063_s9  ;;  %s36_s28 = int_to_ptr.vmem [resolvable:$true] %s35_s28 }
   0x6   :  { %p1067_p1 = scmp.lt.u32.totalorder %s1063_s9, %s1395_s1 }
   0x8   :  { %p1069_p2 = pnand %p1067_p1, %p1064_p0 }
   0xa   :  { %1072 = shalt.err (!%p1069_p2)
}
   0xb   :  { %s1073_s14 = scalar_lea.vmem %s36_s28, 128  ;;  %p1078_p4 = scmp.lt.s32.totalorder %s36_s28, %s36_s28 }
   0xc   :  { %p1074_p3 = scmp.ne.s32.totalorder %s36_s28, %s1073_s14  ;;  %p1079_p5 = scmp.lt.s32.totalorder %s1073_s14, %s1073_s14 }
   0xe   :  { %p1080_p6 = por %p1079_p5, %p1078_p4 }
  0x10   :  { %p1081_p7 = pnand %p1080_p6, %p1074_p3 }
  0x12   :  { %1084 = shalt.err (!%p1081_p7)
}
  0x13   :  { %38 = dma.hbm_to_vmem [thread:$0]  %s1395_s1, 128, %s36_s28, [#allocation6]  }
  0x14   :  { %s1228_s17 = smov [#allocation8]   ;;  %s1229_s19 = smov [#allocation2]  }
  0x15   :  { %s56_s18 = sshll.u32 %s1228_s17, 4  ;;  %s25_s20 = sshll.u32 %s1229_s19, 4  ;;  %s57_s18 = int_to_ptr.vmem [resolvable:$true] %s56_s18  ;;  %s26_s20 = int_to_ptr.vmem [resolvable:$true] %s25_s20 }
  0x16   :  { %s1085_s23 = scalar_lea.hbm %s1397_s3, 8192 }
  0x17   :  { %p1086_p8 = scmp.ne.s32.totalorder %s1397_s3, %s1085_s23  ;;  %p1089_p9 = scmp.lt.u32.totalorder %s1085_s23, %s1397_s3 }
  0x19   :  { %p1091_p10 = pnand %p1089_p9, %p1086_p8 }
  0x1b   :  { %1094 = shalt.err (!%p1091_p10)
}
  0x1c   :  { %s1095_s1 = scalar_lea.vmem %s57_s18, 8192  ;;  %p1100_p12 = scmp.lt.s32.totalorder %s57_s18, %s57_s18 }
  0x1d   :  { %p1096_p11 = scmp.ne.s32.totalorder %s57_s18, %s1095_s1  ;;  %p1101_p13 = scmp.lt.s32.totalorder %s1095_s1, %s1095_s1 }
  0x1f   :  { %p1102_p0 = por %p1101_p13, %p1100_p12 }
  0x21   :  { %p1103_p1 = pnand %p1102_p0, %p1096_p11 }
  0x23   :  { %1106 = shalt.err (!%p1103_p1)
}
  0x24   :  { %s1230_s28 = smov 512   ;;  %s1231_s29 = smov 32  }
  0x25   :  { %62 = dma.hbm_to_vmem [thread:$0]  %s1397_s3, 8192, %s57_s18, [#allocation9], %s1230_s28, %s1230_s28, %s1231_s29  }
  0x26   :  { %s1107_s12 = scalar_lea.hbm %s1394_s0, 128 }
  0x27   :  { %p1108_p2 = scmp.ne.s32.totalorder %s1394_s0, %s1107_s12  ;;  %p1111_p3 = scmp.lt.u32.totalorder %s1107_s12, %s1394_s0 }
  0x29   :  { %p1113_p4 = pnand %p1111_p3, %p1108_p2 }
  0x2b   :  { %1116 = shalt.err (!%p1113_p4)
}
  0x2c   :  { %s1117_s17 = scalar_lea.vmem %s26_s20, 128  ;;  %p1122_p6 = scmp.lt.s32.totalorder %s26_s20, %s26_s20 }
  0x2d   :  { %p1118_p5 = scmp.ne.s32.totalorder %s26_s20, %s1117_s17  ;;  %p1123_p7 = scmp.lt.s32.totalorder %s1117_s17, %s1117_s17 }
  0x2f   :  { %p1124_p8 = por %p1123_p7, %p1122_p6 }
  0x31   :  { %p1125_p9 = pnand %p1124_p8, %p1118_p5 }
  0x33   :  { %1128 = shalt.err (!%p1125_p9)
}
  0x34   :  { %28 = dma.hbm_to_vmem [thread:$0]  %s1394_s0, 128, %s26_s20, [#allocation3]  }
  0x35   :  { %s1232_s19 = smov [#allocation7]   ;;  %s1233_s22 = smov [#allocation10]  }
  0x36   :  { %s44_s21 = sshll.u32 %s1232_s19, 4  ;;  %s70_s23 = sshll.u32 %s1233_s22, 4  ;;  %s45_s21 = int_to_ptr.vmem [resolvable:$true] %s44_s21  ;;  %s71_s23 = int_to_ptr.vmem [resolvable:$true] %s70_s23 }
  0x37   :  { %s1129_s26 = scalar_lea.hbm %s1396_s2, 8192 }
  0x38   :  { %p1130_p10 = scmp.ne.s32.totalorder %s1396_s2, %s1129_s26  ;;  %p1133_p11 = scmp.lt.u32.totalorder %s1129_s26, %s1396_s2 }
  0x3a   :  { %p1135_p12 = pnand %p1133_p11, %p1130_p10 }
  0x3c   :  { %1138 = shalt.err (!%p1135_p12)
}
  0x3d   :  { %s1139_s0 = scalar_lea.vmem %s45_s21, 8192  ;;  %p1144_p0 = scmp.lt.s32.totalorder %s45_s21, %s45_s21 }
  0x3e   :  { %p1140_p13 = scmp.ne.s32.totalorder %s45_s21, %s1139_s0  ;;  %p1145_p1 = scmp.lt.s32.totalorder %s1139_s0, %s1139_s0 }
  0x40   :  { %p1146_p2 = por %p1145_p1, %p1144_p0 }
  0x42   :  { %p1147_p3 = pnand %p1146_p2, %p1140_p13 }
  0x44   :  { %1150 = shalt.err (!%p1147_p3)
}
  0x45   :  { %50 = dma.hbm_to_vmem [thread:$0]  %s1396_s2, 8192, %s45_s21, [#allocation6], %s1230_s28, %s1230_s28, %s1231_s29  }
  0x46   :  { %s1151_s13 = scalar_lea.hbm %s1399_s5, 8192 }
  0x47   :  { %p1152_p4 = scmp.ne.s32.totalorder %s1399_s5, %s1151_s13  ;;  %p1155_p5 = scmp.lt.u32.totalorder %s1151_s13, %s1399_s5 }
  0x49   :  { %p1157_p6 = pnand %p1155_p5, %p1152_p4 }
  0x4b   :  { %1160 = shalt.err (!%p1157_p6)
}
  0x4c   :  { %s1161_s3 = scalar_lea.vmem %s71_s23, 8192  ;;  %p1166_p8 = scmp.lt.s32.totalorder %s71_s23, %s71_s23 }
  0x4d   :  { %p1162_p7 = scmp.ne.s32.totalorder %s71_s23, %s1161_s3  ;;  %p1167_p9 = scmp.lt.s32.totalorder %s1161_s3, %s1161_s3 }
  0x4f   :  { %p1168_p10 = por %p1167_p9, %p1166_p8 }
  0x51   :  { %p1169_p11 = pnand %p1168_p10, %p1162_p7 }
  0x53   :  { %1172 = shalt.err (!%p1169_p11)
}
  0x54   :  { %s1234_s2 = smov 128   ;;  %s1235_s28 = smov 8  }
  0x55   :  { %76 = dma.hbm_to_vmem [thread:$0]  %s1399_s5, 8192, %s71_s23, [#allocation9], %s1234_s2, %s1234_s2, %s1235_s28  }
  0x56   :  { %1217 = dma.done.wait [#allocation3], 128  }
  0x57   :  { %1218 = vsyncadd [#allocation3], 4294967168 }
  0x58   :  { %1219 = dma.done.wait [#allocation6], 8320  }
  0x59   :  { %1220 = vsyncadd [#allocation6], 4294958976 }
  0x5a   :  { %1221 = dma.done.wait [#allocation9], 16384  }
  0x5b   :  { %1222 = vsyncadd [#allocation9], 4294950912  ;;  %v1236_v0 = vmov 0.0   ;;  %v161_v1 = vld [vmem:[#allocation8 + $0x8] sm:$0xff]  ;;  %v163_v3 = vld [vmem:[#allocation8 + $0x18] sm:$0xff]  ;;  %s1237_s22 = smov [#allocation11]  }
  0x5c   :  { %288 = vmatprep.mubr.f32.mxu0 %v1236_v0  ;;  %359 = vmatprep.mubr.f32.mxu1 %v1236_v0  ;;  %v165_v2 = vld [vmem:[#allocation8 + $0x28] sm:$0xff]  ;;  %v167_v5 = vld [vmem:[#allocation8 + $0x38] sm:$0xff]  ;;  %v160_v6 = vld [vmem:[#allocation8] sm:$0xff]  ;;  %s759_s23 = sshll.u32 %s1237_s22, 4  ;;  %s1238_s24 = smov [#allocation12]   ;;  %s760_s23 = int_to_ptr.vmem [resolvable:$true] %s759_s23 }
  0x5d   :  { %v855_v4 = vpack.c.bf16 %v165_v2, %v161_v1  ;;  %v164_v7 = vld [vmem:[#allocation8 + $0x20] sm:$0xff]  ;;  %v887_v8 = vpack.c.bf16 %v167_v5, %v163_v3  ;;  %v162_v10 = vld [vmem:[#allocation8 + $0x10] sm:$0xff]  ;;  %v169_v12 = vld [vmem:[#allocation8 + $0x48] sm:$0xff]  ;;  %s769_s25 = sshll.u32 %s1238_s24, 4  ;;  %s1173_s26 = scalar_lea.vmem %s760_s23, 128  ;;  %s770_s25 = int_to_ptr.vmem [resolvable:$true] %s769_s25 }
  0x5e   :  { %v857_v9 = vpack.c.bf16 %v164_v7, %v160_v6  ;;  %v166_v11 = vld [vmem:[#allocation8 + $0x30] sm:$0xff]  ;;  %v173_v14 = vld [vmem:[#allocation8 + $0x68] sm:$0xff]  ;;  %v171_v15 = vld [vmem:[#allocation8 + $0x58] sm:$0xff]  ;;  %p1174_p12 = scmp.ne.s32.totalorder %s760_s23, %s1173_s26  ;;  %p1178_p13 = scmp.lt.s32.totalorder %s760_s23, %s760_s23 }
  0x5f   :  { %856 = vmatprep.subr.bf16.mxu0 %v855_v4  ;;  %v889_v13 = vpack.c.bf16 %v166_v11, %v162_v10  ;;  %v175_v16 = vld [vmem:[#allocation8 + $0x78] sm:$0xff]  ;;  %888 = vmatprep.subr.bf16.mxu1 %v887_v8  ;;  %v859_v17 = vpack.c.bf16 %v173_v14, %v169_v12  ;;  %v168_v19 = vld [vmem:[#allocation8 + $0x40] sm:$0xff]  ;;  %v170_v21 = vld [vmem:[#allocation8 + $0x50] sm:$0xff]  ;;  %p1179_p0 = scmp.lt.s32.totalorder %s1173_s26, %s1173_s26 }
  0x60   :  { %858 = vmatpush1.bf16.msra.mxu0 %v857_v9  ;;  %v891_v18 = vpack.c.bf16 %v175_v16, %v171_v15  ;;  %v172_v20 = vld [vmem:[#allocation8 + $0x60] sm:$0xff]  ;;  %v174_v23 = vld [vmem:[#allocation8 + $0x70] sm:$0xff]  ;;  %v177_v24 = vld [vmem:[#allocation8 + $0x88] sm:$0xff] }
  0x61   :  { %890 = vmatpush1.bf16.msra.mxu1 %v889_v13  ;;  %v861_v22 = vpack.c.bf16 %v172_v20, %v168_v19  ;;  %v181_v25 = vld [vmem:[#allocation8 + $0xa8] sm:$0xff]  ;;  %860 = vmatprep.subr.bf16.mxu0 %v859_v17  ;;  %v893_v26 = vpack.c.bf16 %v174_v23, %v170_v21  ;;  %v179_v28 = vld [vmem:[#allocation8 + $0x98] sm:$0xff]  ;;  %v176_v30 = vld [vmem:[#allocation8 + $0x80] sm:$0xff]  ;;  %p1180_p1 = por %p1179_p0, %p1178_p13 }
  0x62   :  { %892 = vmatprep.subr.bf16.mxu1 %v891_v18  ;;  %v863_v27 = vpack.c.bf16 %v181_v25, %v177_v24  ;;  %v183_v29 = vld [vmem:[#allocation8 + $0xb8] sm:$0xff]  ;;  %v180_v32 = vld [vmem:[#allocation8 + $0xa0] sm:$0xff]  ;;  %v178_v33 = vld [vmem:[#allocation8 + $0x90] sm:$0xff] }
  0x63   :  { %v895_v31 = vpack.c.bf16 %v183_v29, %v179_v28  ;;  %v182_v34 = vld [vmem:[#allocation8 + $0xb0] sm:$0xff]  ;;  %v865_v35 = vpack.c.bf16 %v180_v32, %v176_v30  ;;  %v185_v36 = vld [vmem:[#allocation8 + $0xc8] sm:$0xff]  ;;  %v187_v38 = vld [vmem:[#allocation8 + $0xd8] sm:$0xff]  ;;  %p1181_p2 = pnand %p1180_p1, %p1174_p12 }
  0x64   :  { %862 = vmatpush1.bf16.msra.mxu0 %v861_v22  ;;  %v189_v37 = vld [vmem:[#allocation8 + $0xe8] sm:$0xff]  ;;  %v897_v39 = vpack.c.bf16 %v182_v34, %v178_v33  ;;  %v191_v41 = vld [vmem:[#allocation8 + $0xf8] sm:$0xff]  ;;  %v184_v42 = vld [vmem:[#allocation8 + $0xc0] sm:$0xff] }
  0x65   :  { %894 = vmatpush1.bf16.msra.mxu1 %v893_v26  ;;  %864 = vmatprep.subr.bf16.mxu0 %v863_v27  ;;  %v867_v40 = vpack.c.bf16 %v189_v37, %v185_v36  ;;  %v188_v43 = vld [vmem:[#allocation8 + $0xe0] sm:$0xff]  ;;  %v899_v44 = vpack.c.bf16 %v191_v41, %v187_v38  ;;  %v186_v45 = vld [vmem:[#allocation8 + $0xd0] sm:$0xff]  ;;  %v193_v47 = vld [vmem:[#allocation8 + $0x108] sm:$0xff] }
  0x66   :  { %896 = vmatprep.subr.bf16.mxu1 %v895_v31  ;;  %v190_v46 = vld [vmem:[#allocation8 + $0xf0] sm:$0xff]  ;;  %v197_v48 = vld [vmem:[#allocation8 + $0x128] sm:$0xff]  ;;  %v195_v49 = vld [vmem:[#allocation8 + $0x118] sm:$0xff]  ;;  %v869_v51 = vpack.c.bf16 %v188_v43, %v184_v42 }
  0x67   :  { %v199_v50 = vld [vmem:[#allocation8 + $0x138] sm:$0xff]  ;;  %v901_v52 = vpack.c.bf16 %v190_v46, %v186_v45  ;;  %v871_v53 = vpack.c.bf16 %v197_v48, %v193_v47  ;;  %v192_v54 = vld [vmem:[#allocation8 + $0x100] sm:$0xff]  ;;  %v194_v56 = vld [vmem:[#allocation8 + $0x110] sm:$0xff] }
  0x68   :  { %866 = vmatpush1.bf16.msra.mxu0 %v865_v35  ;;  %v196_v55 = vld [vmem:[#allocation8 + $0x120] sm:$0xff]  ;;  %v903_v57 = vpack.c.bf16 %v199_v50, %v195_v49  ;;  %v198_v58 = vld [vmem:[#allocation8 + $0x130] sm:$0xff]  ;;  %v201_v59 = vld [vmem:[#allocation8 + $0x148] sm:$0xff] }
  0x69   :  { %898 = vmatpush1.bf16.msra.mxu1 %v897_v39  ;;  %868 = vmatprep.subr.bf16.mxu0 %v867_v40  ;;  %v205_v60 = vld [vmem:[#allocation8 + $0x168] sm:$0xff]  ;;  %v203_v61 = vld [vmem:[#allocation8 + $0x158] sm:$0xff]  ;;  %v873_v63 = vpack.c.bf16 %v196_v55, %v192_v54  ;;  %v905_v1 = vpack.c.bf16 %v198_v58, %v194_v56  ;;  %v200_v3 = vld [vmem:[#allocation8 + $0x140] sm:$0xff] }
  0x6a   :  { %900 = vmatprep.subr.bf16.mxu1 %v899_v44  ;;  %v207_v62 = vld [vmem:[#allocation8 + $0x178] sm:$0xff]  ;;  %v875_v2 = vpack.c.bf16 %v205_v60, %v201_v59  ;;  %v204_v4 = vld [vmem:[#allocation8 + $0x160] sm:$0xff]  ;;  %v202_v5 = vld [vmem:[#allocation8 + $0x150] sm:$0xff] }
  0x6b   :  { %v907_v6 = vpack.c.bf16 %v207_v62, %v203_v61  ;;  %v206_v7 = vld [vmem:[#allocation8 + $0x170] sm:$0xff]  ;;  %v209_v8 = vld [vmem:[#allocation8 + $0x188] sm:$0xff]  ;;  %v211_v10 = vld [vmem:[#allocation8 + $0x198] sm:$0xff]  ;;  %v877_v12 = vpack.c.bf16 %v204_v4, %v200_v3 }
  0x6c   :  { %870 = vmatpush1.bf16.msra.mxu0 %v869_v51  ;;  %v213_v9 = vld [vmem:[#allocation8 + $0x1a8] sm:$0xff]  ;;  %v215_v11 = vld [vmem:[#allocation8 + $0x1b8] sm:$0xff]  ;;  %v909_v13 = vpack.c.bf16 %v206_v7, %v202_v5  ;;  %v208_v15 = vld [vmem:[#allocation8 + $0x180] sm:$0xff] }
  0x6d   :  { %902 = vmatpush1.bf16.msra.mxu1 %v901_v52  ;;  %872 = vmatprep.subr.bf16.mxu0 %v871_v53  ;;  %v879_v14 = vpack.c.bf16 %v213_v9, %v209_v8  ;;  %v212_v16 = vld [vmem:[#allocation8 + $0x1a0] sm:$0xff]  ;;  %v210_v17 = vld [vmem:[#allocation8 + $0x190] sm:$0xff]  ;;  %v911_v18 = vpack.c.bf16 %v215_v11, %v211_v10  ;;  %v217_v20 = vld [vmem:[#allocation8 + $0x1c8] sm:$0xff] }
  0x6e   :  { %904 = vmatprep.subr.bf16.mxu1 %v903_v57  ;;  %v214_v19 = vld [vmem:[#allocation8 + $0x1b0] sm:$0xff]  ;;  %v221_v21 = vld [vmem:[#allocation8 + $0x1e8] sm:$0xff]  ;;  %v219_v22 = vld [vmem:[#allocation8 + $0x1d8] sm:$0xff]  ;;  %v881_v24 = vpack.c.bf16 %v212_v16, %v208_v15 }
  0x6f   :  { %v223_v23 = vld [vmem:[#allocation8 + $0x1f8] sm:$0xff]  ;;  %v913_v25 = vpack.c.bf16 %v214_v19, %v210_v17  ;;  %v883_v26 = vpack.c.bf16 %v221_v21, %v217_v20  ;;  %v216_v27 = vld [vmem:[#allocation8 + $0x1c0] sm:$0xff]  ;;  %v218_v29 = vld [vmem:[#allocation8 + $0x1d0] sm:$0xff] }
  0x70   :  { %874 = vmatpush1.bf16.msra.mxu0 %v873_v63  ;;  %v220_v28 = vld [vmem:[#allocation8 + $0x1e0] sm:$0xff]  ;;  %v915_v30 = vpack.c.bf16 %v223_v23, %v219_v22  ;;  %v222_v31 = vld [vmem:[#allocation8 + $0x1f0] sm:$0xff]  ;;  %v97_v32 = vld [vmem:[#allocation7 + $0x8] sm:$0xff] }
  0x71   :  { %906 = vmatpush1.bf16.msra.mxu1 %v905_v1  ;;  %876 = vmatprep.subr.bf16.mxu0 %v875_v2  ;;  %v101_v33 = vld [vmem:[#allocation7 + $0x28] sm:$0xff]  ;;  %v99_v34 = vld [vmem:[#allocation7 + $0x18] sm:$0xff]  ;;  %v885_v36 = vpack.c.bf16 %v220_v28, %v216_v27  ;;  %v917_v37 = vpack.c.bf16 %v222_v31, %v218_v29  ;;  %v96_v39 = vld [vmem:[#allocation7] sm:$0xff] }
  0x72   :  { %908 = vmatprep.subr.bf16.mxu1 %v907_v6  ;;  %v103_v35 = vld [vmem:[#allocation7 + $0x38] sm:$0xff]  ;;  %v919_v38 = vpack.c.bf16 %v101_v33, %v97_v32  ;;  %v100_v40 = vld [vmem:[#allocation7 + $0x20] sm:$0xff]  ;;  %v98_v41 = vld [vmem:[#allocation7 + $0x10] sm:$0xff] }
  0x73   :  { %v951_v42 = vpack.c.bf16 %v103_v35, %v99_v34  ;;  %v102_v43 = vld [vmem:[#allocation7 + $0x30] sm:$0xff]  ;;  %v105_v44 = vld [vmem:[#allocation7 + $0x48] sm:$0xff]  ;;  %v107_v46 = vld [vmem:[#allocation7 + $0x58] sm:$0xff]  ;;  %v921_v49 = vpack.c.bf16 %v100_v40, %v96_v39 }
  0x74   :  { %878 = vmatpush1.bf16.msra.mxu0 %v877_v12  ;;  %v109_v45 = vld [vmem:[#allocation7 + $0x68] sm:$0xff]  ;;  %v111_v47 = vld [vmem:[#allocation7 + $0x78] sm:$0xff]  ;;  %v953_v50 = vpack.c.bf16 %v102_v43, %v98_v41  ;;  %v104_v52 = vld [vmem:[#allocation7 + $0x40] sm:$0xff] }
  0x75   :  { %910 = vmatpush1.bf16.msra.mxu1 %v909_v13  ;;  %880 = vmatprep.subr.bf16.mxu0 %v879_v14  ;;  %v1352_v48 = vld [vmem:[#allocation5] sm:$0xff]  ;;  %v923_v51 = vpack.c.bf16 %v109_v45, %v105_v44  ;;  %v108_v53 = vld [vmem:[#allocation7 + $0x60] sm:$0xff]  ;;  %v106_v54 = vld [vmem:[#allocation7 + $0x50] sm:$0xff]  ;;  %v955_v55 = vpack.c.bf16 %v111_v47, %v107_v46 }
  0x76   :  { %912 = vmatprep.subr.bf16.mxu1 %v911_v18  ;;  %v110_v56 = vld [vmem:[#allocation7 + $0x70] sm:$0xff]  ;;  %v113_v57 = vld [vmem:[#allocation7 + $0x88] sm:$0xff]  ;;  %v115_v59 = vld [vmem:[#allocation7 + $0x98] sm:$0xff]  ;;  %v925_v61 = vpack.c.bf16 %v108_v53, %v104_v52 }
  0x77   :  { %v117_v58 = vld [vmem:[#allocation7 + $0xa8] sm:$0xff]  ;;  %v119_v60 = vld [vmem:[#allocation7 + $0xb8] sm:$0xff]  ;;  %v957_v62 = vpack.c.bf16 %v110_v56, %v106_v54  ;;  %v112_v1 = vld [vmem:[#allocation7 + $0x80] sm:$0xff] }
  0x78   :  { %882 = vmatpush1.bf16.msra.mxu0 %v881_v24  ;;  %v927_v63 = vpack.c.bf16 %v117_v58, %v113_v57  ;;  %v116_v2 = vld [vmem:[#allocation7 + $0xa0] sm:$0xff]  ;;  %v114_v3 = vld [vmem:[#allocation7 + $0x90] sm:$0xff]  ;;  %v959_v4 = vpack.c.bf16 %v119_v60, %v115_v59  ;;  %v121_v6 = vld [vmem:[#allocation7 + $0xc8] sm:$0xff] }
  0x79   :  { %914 = vmatpush1.bf16.msra.mxu1 %v913_v25  ;;  %884 = vmatprep.subr.bf16.mxu0 %v883_v26  ;;  %v118_v5 = vld [vmem:[#allocation7 + $0xb0] sm:$0xff]  ;;  %v125_v7 = vld [vmem:[#allocation7 + $0xe8] sm:$0xff]  ;;  %v123_v8 = vld [vmem:[#allocation7 + $0xd8] sm:$0xff]  ;;  %v929_v10 = vpack.c.bf16 %v116_v2, %v112_v1 }
  0x7a   :  { %916 = vmatprep.subr.bf16.mxu1 %v915_v30  ;;  %v127_v9 = vld [vmem:[#allocation7 + $0xf8] sm:$0xff]  ;;  %v961_v11 = vpack.c.bf16 %v118_v5, %v114_v3  ;;  %v931_v12 = vpack.c.bf16 %v125_v7, %v121_v6  ;;  %v120_v13 = vld [vmem:[#allocation7 + $0xc0] sm:$0xff]  ;;  %v122_v15 = vld [vmem:[#allocation7 + $0xd0] sm:$0xff] }
  0x7b   :  { %v124_v14 = vld [vmem:[#allocation7 + $0xe0] sm:$0xff]  ;;  %v963_v16 = vpack.c.bf16 %v127_v9, %v123_v8  ;;  %v126_v17 = vld [vmem:[#allocation7 + $0xf0] sm:$0xff]  ;;  %v129_v18 = vld [vmem:[#allocation7 + $0x108] sm:$0xff] }
  0x7c   :  { %886 = vmatpush1.bf16.msra.mxu0 %v885_v36  ;;  %v133_v19 = vld [vmem:[#allocation7 + $0x128] sm:$0xff]  ;;  %v131_v20 = vld [vmem:[#allocation7 + $0x118] sm:$0xff]  ;;  %v933_v22 = vpack.c.bf16 %v124_v14, %v120_v13  ;;  %v128_v24 = vld [vmem:[#allocation7 + $0x100] sm:$0xff] }
  0x7d   :  { %918 = vmatpush1.bf16.msra.mxu1 %v917_v37  ;;  %920 = vmatprep.subr.bf16.mxu0 %v919_v38  ;;  %v135_v21 = vld [vmem:[#allocation7 + $0x138] sm:$0xff]  ;;  %v935_v23 = vpack.c.bf16 %v133_v19, %v129_v18  ;;  %v132_v25 = vld [vmem:[#allocation7 + $0x120] sm:$0xff]  ;;  %v130_v26 = vld [vmem:[#allocation7 + $0x110] sm:$0xff] }
  0x7e   :  { %952 = vmatprep.subr.bf16.mxu1 %v951_v42  ;;  %v967_v27 = vpack.c.bf16 %v135_v21, %v131_v20  ;;  %v134_v28 = vld [vmem:[#allocation7 + $0x130] sm:$0xff]  ;;  %v137_v29 = vld [vmem:[#allocation7 + $0x148] sm:$0xff]  ;;  %v139_v31 = vld [vmem:[#allocation7 + $0x158] sm:$0xff]  ;;  %v937_v33 = vpack.c.bf16 %v132_v25, %v128_v24 }
  0x7f   :  { %289 = vmatmul.mubr.f32.vlgmr.msra.gmra.mrb[0].mxu0 %v1352_v48  ;;  %v141_v30 = vld [vmem:[#allocation7 + $0x168] sm:$0xff]  ;;  %v143_v32 = vld [vmem:[#allocation7 + $0x178] sm:$0xff]  ;;  %v969_v34 = vpack.c.bf16 %v134_v28, %v130_v26  ;;  %v136_v36 = vld [vmem:[#allocation7 + $0x140] sm:$0xff] }
  0x80   :  { %360 = vmatmul.mubr.f32.vlgmr.msra.gmra.mrb[0].mxu1 %v1352_v48  ;;  %922 = vmatpush1.bf16.msra.mxu0 %v921_v49  ;;  %v939_v35 = vpack.c.bf16 %v141_v30, %v137_v29  ;;  %v140_v37 = vld [vmem:[#allocation7 + $0x160] sm:$0xff]  ;;  %v138_v38 = vld [vmem:[#allocation7 + $0x150] sm:$0xff]  ;;  %v971_v39 = vpack.c.bf16 %v143_v32, %v139_v31  ;;  %v145_v41 = vld [vmem:[#allocation7 + $0x188] sm:$0xff] }
  0x81   :  { %954 = vmatpush1.bf16.msra.mxu1 %v953_v50  ;;  %924 = vmatprep.subr.bf16.mxu0 %v923_v51  ;;  %v142_v40 = vld [vmem:[#allocation7 + $0x170] sm:$0xff]  ;;  %v149_v42 = vld [vmem:[#allocation7 + $0x1a8] sm:$0xff]  ;;  %v147_v43 = vld [vmem:[#allocation7 + $0x198] sm:$0xff]  ;;  %v941_v45 = vpack.c.bf16 %v140_v37, %v136_v36 }
  0x82   :  { %956 = vmatprep.subr.bf16.mxu1 %v955_v55  ;;  %430 = vmatprep.mubr.f32.mxu0 %v1236_v0  ;;  %v151_v44 = vld [vmem:[#allocation7 + $0x1b8] sm:$0xff]  ;;  %v973_v46 = vpack.c.bf16 %v142_v40, %v138_v38  ;;  %v943_v47 = vpack.c.bf16 %v149_v42, %v145_v41  ;;  %v144_v49 = vld [vmem:[#allocation7 + $0x180] sm:$0xff]  ;;  %v146_v51 = vld [vmem:[#allocation7 + $0x190] sm:$0xff] }
  0x83   :  { %501 = vmatprep.mubr.f32.mxu1 %v1236_v0  ;;  %v965_v0 = vpack.c.bf16 %v126_v17, %v122_v15  ;;  %v148_v50 = vld [vmem:[#allocation7 + $0x1a0] sm:$0xff]  ;;  %v975_v52 = vpack.c.bf16 %v151_v44, %v147_v43  ;;  %v150_v53 = vld [vmem:[#allocation7 + $0x1b0] sm:$0xff]  ;;  %v153_v54 = vld [vmem:[#allocation7 + $0x1c8] sm:$0xff] }
  0x84   :  { %926 = vmatpush1.bf16.msra.mxu0 %v925_v61  ;;  %v157_v55 = vld [vmem:[#allocation7 + $0x1e8] sm:$0xff]  ;;  %v155_v56 = vld [vmem:[#allocation7 + $0x1d8] sm:$0xff]  ;;  %v945_v58 = vpack.c.bf16 %v148_v50, %v144_v49  ;;  %v977_v59 = vpack.c.bf16 %v150_v53, %v146_v51  ;;  %v152_v61 = vld [vmem:[#allocation7 + $0x1c0] sm:$0xff] }
  0x85   :  { %958 = vmatpush1.bf16.msra.mxu1 %v957_v62  ;;  %928 = vmatprep.subr.bf16.mxu0 %v927_v63  ;;  %v159_v57 = vld [vmem:[#allocation7 + $0x1f8] sm:$0xff]  ;;  %v947_v60 = vpack.c.bf16 %v157_v55, %v153_v54  ;;  %v156_v62 = vld [vmem:[#allocation7 + $0x1e0] sm:$0xff]  ;;  %v154_v63 = vld [vmem:[#allocation7 + $0x1d0] sm:$0xff] }
  0x86   :  { %960 = vmatprep.subr.bf16.mxu1 %v959_v4  ;;  %v979_v1 = vpack.c.bf16 %v159_v57, %v155_v56  ;;  %v158_v2 = vld [vmem:[#allocation7 + $0x1f0] sm:$0xff]  ;;  %v554_v3 = vld [vmem:[#allocation10 + $0x80] sm:$0xff]  ;;  %v555_v4 = vld [vmem:[#allocation10 + $0x88] sm:$0xff]  ;;  %v949_v7 = vpack.c.bf16 %v156_v62, %v152_v61 }
  0x87   :  { %v586_v5 = vld [vmem:[#allocation10 + $0x180] sm:$0xff]  ;;  %v587_v6 = vld [vmem:[#allocation10 + $0x188] sm:$0xff]  ;;  %v981_v8 = vpack.c.bf16 %v158_v2, %v154_v63  ;;  %v983_v9 = vpack.c.bf16 %v555_v4, %v554_v3  ;;  %v556_v15 = vld [vmem:[#allocation10 + $0x90] sm:$0xff] }
  0x88   :  { %930 = vmatpush1.bf16.msra.mxu0 %v929_v10  ;;  %v538_v10 = vld [vmem:[#allocation10] sm:$0xff]  ;;  %v1015_v13 = vpack.c.bf16 %v587_v6, %v586_v5  ;;  %v571_v14 = vld [vmem:[#allocation10 + $0x108] sm:$0xff]  ;;  %v588_v17 = vld [vmem:[#allocation10 + $0x190] sm:$0xff] }
  0x89   :  { %962 = vmatpush1.bf16.msra.mxu1 %v961_v11  ;;  %932 = vmatprep.subr.bf16.mxu0 %v931_v12  ;;  %v539_v11 = vld [vmem:[#allocation10 + $0x8] sm:$0xff]  ;;  %v570_v12 = vld [vmem:[#allocation10 + $0x100] sm:$0xff]  ;;  %v589_v18 = vld [vmem:[#allocation10 + $0x198] sm:$0xff] }
  0x8a   :  { %964 = vmatprep.subr.bf16.mxu1 %v963_v16  ;;  %v557_v16 = vld [vmem:[#allocation10 + $0x98] sm:$0xff]  ;;  %v1358_v19 = vld [vmem:[#allocation2] sm:$0xff]  ;;  %v985_v20 = vpack.c.bf16 %v539_v11, %v538_v10  ;;  %v1017_v21 = vpack.c.bf16 %v571_v14, %v570_v12  ;;  %v1019_v25 = vpack.c.bf16 %v589_v18, %v588_v17  ;;  %v559_v28 = vld [vmem:[#allocation10 + $0xa8] sm:$0xff] }
  0x8b   :  { %v572_v24 = vld [vmem:[#allocation10 + $0x110] sm:$0xff]  ;;  %v573_v26 = vld [vmem:[#allocation10 + $0x118] sm:$0xff]  ;;  %v590_v29 = vld [vmem:[#allocation10 + $0x1a0] sm:$0xff] }
  0x8c   :  { %934 = vmatpush1.bf16.msra.mxu0 %v933_v22  ;;  %v987_v22 = vpack.c.bf16 %v557_v16, %v556_v15  ;;  %v591_v30 = vld [vmem:[#allocation10 + $0x1a8] sm:$0xff]  ;;  %v1021_v32 = vpack.c.bf16 %v573_v26, %v572_v24  ;;  %v574_v36 = vld [vmem:[#allocation10 + $0x120] sm:$0xff]  ;;  %v561_v40 = vld [vmem:[#allocation10 + $0xb8] sm:$0xff] }
  0x8d   :  { %966 = vmatpush1.bf16.msra.mxu1 %v965_v0  ;;  %936 = vmatprep.subr.bf16.mxu0 %v935_v23  ;;  %v540_v0 = vld [vmem:[#allocation10 + $0x10] sm:$0xff]  ;;  %v541_v23 = vld [vmem:[#allocation10 + $0x18] sm:$0xff]  ;;  %v1023_v37 = vpack.c.bf16 %v591_v30, %v590_v29  ;;  %v575_v38 = vld [vmem:[#allocation10 + $0x128] sm:$0xff] }
  0x8e   :  { %968 = vmatprep.subr.bf16.mxu1 %v967_v27  ;;  %v558_v27 = vld [vmem:[#allocation10 + $0xa0] sm:$0xff]  ;;  %v989_v31 = vpack.c.bf16 %v541_v23, %v540_v0  ;;  %v592_v41 = vld [vmem:[#allocation10 + $0x1b0] sm:$0xff]  ;;  %v593_v42 = vld [vmem:[#allocation10 + $0x1b8] sm:$0xff]  ;;  %v1025_v44 = vpack.c.bf16 %v575_v38, %v574_v36 }
  0x8f   :  { %v576_v49 = vld [vmem:[#allocation10 + $0x130] sm:$0xff]  ;;  %v1027_v50 = vpack.c.bf16 %v593_v42, %v592_v41  ;;  %v577_v51 = vld [vmem:[#allocation10 + $0x138] sm:$0xff]  ;;  %v563_v53 = vld [vmem:[#allocation10 + $0xc8] sm:$0xff] }
  0x90   :  { %938 = vmatpush1.bf16.msra.mxu0 %v937_v33  ;;  %v991_v33 = vpack.c.bf16 %v559_v28, %v558_v27  ;;  %v594_v54 = vld [vmem:[#allocation10 + $0x1c0] sm:$0xff]  ;;  %v595_v55 = vld [vmem:[#allocation10 + $0x1c8] sm:$0xff]  ;;  %v1029_v57 = vpack.c.bf16 %v577_v51, %v576_v49  ;;  %v565_v2 = vld [vmem:[#allocation10 + $0xd8] sm:$0xff] }
  0x91   :  { %970 = vmatpush1.bf16.msra.mxu1 %v969_v34  ;;  %940 = vmatprep.subr.bf16.mxu0 %v939_v35  ;;  %v542_v34 = vld [vmem:[#allocation10 + $0x20] sm:$0xff]  ;;  %v543_v35 = vld [vmem:[#allocation10 + $0x28] sm:$0xff]  ;;  %v1031_v62 = vpack.c.bf16 %v595_v55, %v594_v54  ;;  %v596_v3 = vld [vmem:[#allocation10 + $0x1d0] sm:$0xff] }
  0x92   :  { %972 = vmatprep.subr.bf16.mxu1 %v971_v39  ;;  %v560_v39 = vld [vmem:[#allocation10 + $0xb0] sm:$0xff]  ;;  %v993_v43 = vpack.c.bf16 %v543_v35, %v542_v34  ;;  %v578_v61 = vld [vmem:[#allocation10 + $0x140] sm:$0xff]  ;;  %v579_v63 = vld [vmem:[#allocation10 + $0x148] sm:$0xff] }
  0x93   :  { %v597_v4 = vld [vmem:[#allocation10 + $0x1d8] sm:$0xff]  ;;  %v1033_v6 = vpack.c.bf16 %v579_v63, %v578_v61  ;;  %v580_v10 = vld [vmem:[#allocation10 + $0x150] sm:$0xff]  ;;  %v567_v14 = vld [vmem:[#allocation10 + $0xe8] sm:$0xff] }
  0x94   :  { %942 = vmatpush1.bf16.msra.mxu0 %v941_v45  ;;  %v995_v45 = vpack.c.bf16 %v561_v40, %v560_v39  ;;  %v1035_v11 = vpack.c.bf16 %v597_v4, %v596_v3  ;;  %v581_v12 = vld [vmem:[#allocation10 + $0x158] sm:$0xff]  ;;  %v598_v15 = vld [vmem:[#allocation10 + $0x1e0] sm:$0xff]  ;;  %v599_v16 = vld [vmem:[#allocation10 + $0x1e8] sm:$0xff]  ;;  %v510_v39 = vlaneseq }
  0x95   :  { %974 = vmatpush1.bf16.msra.mxu1 %v973_v46  ;;  %944 = vmatprep.subr.bf16.mxu0 %v943_v47  ;;  %v544_v46 = vld [vmem:[#allocation10 + $0x30] sm:$0xff]  ;;  %v545_v47 = vld [vmem:[#allocation10 + $0x38] sm:$0xff]  ;;  %v1037_v18 = vpack.c.bf16 %v581_v12, %v580_v10  ;;  %v551_v0 = vld [vmem:[#allocation10 + $0x68] sm:$0xff] }
  0x96   :  { %976 = vmatprep.subr.bf16.mxu1 %v975_v52  ;;  %v562_v52 = vld [vmem:[#allocation10 + $0xc0] sm:$0xff]  ;;  %v997_v56 = vpack.c.bf16 %v545_v47, %v544_v46  ;;  %v568_v27 = vld [vmem:[#allocation10 + $0xf0] sm:$0xff]  ;;  %v569_v28 = vld [vmem:[#allocation10 + $0xf8] sm:$0xff]  ;;  %v511_v40 = vshrl.u32 %v510_v39, 7 }
  0x97   :  { %v582_v23 = vld [vmem:[#allocation10 + $0x160] sm:$0xff]  ;;  %v600_v29 = vld [vmem:[#allocation10 + $0x1f0] sm:$0xff]  ;;  %v1011_v30 = vpack.c.bf16 %v569_v28, %v568_v27 }
  0x98   :  { %946 = vmatpush1.bf16.msra.mxu0 %v945_v58  ;;  %v999_v58 = vpack.c.bf16 %v563_v53, %v562_v52  ;;  %v584_v36 = vld [vmem:[#allocation10 + $0x170] sm:$0xff]  ;;  %v512_v41 = vsub.s32 0, %v511_v40 }
  0x99   :  { %978 = vmatpush1.bf16.msra.mxu1 %v977_v59  ;;  %948 = vmatprep.subr.bf16.mxu0 %v947_v60  ;;  %v546_v59 = vld [vmem:[#allocation10 + $0x40] sm:$0xff]  ;;  %v547_v60 = vld [vmem:[#allocation10 + $0x48] sm:$0xff]  ;;  %v508_v42 = vld [vmem:[%s1398_s4] sm:$0xf] }
  0x9a   :  { %980 = vmatprep.subr.bf16.mxu1 %v979_v1  ;;  %v564_v1 = vld [vmem:[#allocation10 + $0xd0] sm:$0xff]  ;;  %v1001_v5 = vpack.c.bf16 %v547_v60, %v546_v59  ;;  %v513_v46 = vrot.slane %v508_v42, %v512_v41 }
  0x9c   :  { %950 = vmatpush1.bf16.msra.mxu0 %v949_v7  ;;  %v1003_v7 = vpack.c.bf16 %v565_v2, %v564_v1  ;;  %v784_v2 = vld [vmem:[%s1400_s6] ss:$0 sm:$0xff] }
  0x9d   :  { %982 = vmatpush1.bf16.msra.mxu1 %v981_v8  ;;  %984 = vmatprep.subr.bf16.mxu0 %v983_v9  ;;  %v548_v8 = vld [vmem:[#allocation10 + $0x50] sm:$0xff]  ;;  %v549_v9 = vld [vmem:[#allocation10 + $0x58] sm:$0xff] }
  0x9e   :  { %1016 = vmatprep.subr.bf16.mxu1 %v1015_v13  ;;  %v566_v13 = vld [vmem:[#allocation10 + $0xe0] sm:$0xff]  ;;  %v1005_v17 = vpack.c.bf16 %v549_v9, %v548_v8 }
  0x9f   :  { %431 = vmatmul.mubr.f32.vlgmr.msra.gmra.mrb[0].mxu0 %v1358_v19 }
  0xa0   :  { %502 = vmatmul.mubr.f32.vlgmr.msra.gmra.mrb[0].mxu1 %v1358_v19  ;;  %986 = vmatpush3.bf16.msra.mxu0 %v985_v20  ;;  %v1007_v20 = vpack.c.bf16 %v567_v14, %v566_v13 }
  0xa1   :  { %1018 = vmatpush3.bf16.msra.mxu1 %v1017_v21  ;;  %988 = vmatprep.subr.bf16.mxu0 %v987_v22  ;;  %v1039_v21 = vpack.c.bf16 %v599_v16, %v598_v15  ;;  %v550_v22 = vld [vmem:[#allocation10 + $0x60] sm:$0xff] }
  0xa2   :  { %1020 = vmatprep.subr.bf16.mxu1 %v1019_v25  ;;  %v1009_v24 = vpack.c.bf16 %v551_v0, %v550_v22  ;;  %v583_v25 = vld [vmem:[#allocation10 + $0x168] sm:$0xff] }
  0xa3   :  { %v1041_v26 = vpack.c.bf16 %v583_v25, %v582_v23 }
  0xa4   :  { %990 = vmatpush3.bf16.msra.mxu0 %v989_v31  ;;  %v601_v31 = vld [vmem:[#allocation10 + $0x1f8] sm:$0xff] }
  0xa5   :  { %1022 = vmatpush3.bf16.msra.mxu1 %v1021_v32  ;;  %992 = vmatprep.subr.bf16.mxu0 %v991_v33  ;;  %v552_v32 = vld [vmem:[#allocation10 + $0x70] sm:$0xff]  ;;  %v553_v33 = vld [vmem:[#allocation10 + $0x78] sm:$0xff]  ;;  %v1043_v34 = vpack.c.bf16 %v601_v31, %v600_v29 }
  0xa6   :  { %1024 = vmatprep.subr.bf16.mxu1 %v1023_v37  ;;  %v1013_v35 = vpack.c.bf16 %v553_v33, %v552_v32  ;;  %v585_v37 = vld [vmem:[#allocation10 + $0x178] sm:$0xff] }
  0xa7   :  { %v1045_v38 = vpack.c.bf16 %v585_v37, %v584_v36 }
  0xa8   :  { %994 = vmatpush3.bf16.msra.mxu0 %v993_v43  ;;  %v520_v43 = vsub.s32 2, %v511_v40 }
  0xa9   :  { %1026 = vmatpush3.bf16.msra.mxu1 %v1025_v44  ;;  %996 = vmatprep.subr.bf16.mxu0 %v995_v45  ;;  %v516_v44 = vsub.s32 1, %v511_v40  ;;  %v524_v45 = vsub.s32 3, %v511_v40 }
  0xaa   :  { %1028 = vmatprep.subr.bf16.mxu1 %v1027_v50  ;;  %v521_v47 = vrot.slane %v508_v42, %v520_v43 }
  0xab   :  { %v517_v49 = vrot.slane %v508_v42, %v516_v44  ;;  %v525_v50 = vrot.slane %v508_v42, %v524_v45 }
  0xac   :  { %998 = vmatpush3.bf16.msra.mxu0 %v997_v56 }
  0xad   :  { %1030 = vmatpush3.bf16.msra.mxu1 %v1029_v57  ;;  %1000 = vmatprep.subr.bf16.mxu0 %v999_v58 }
  0xae   :  { %1032 = vmatprep.subr.bf16.mxu1 %v1031_v62 }
  0xb0   :  { %1002 = vmatpush3.bf16.msra.mxu0 %v1001_v5 }
  0xb1   :  { %1034 = vmatpush3.bf16.msra.mxu1 %v1033_v6  ;;  %1004 = vmatprep.subr.bf16.mxu0 %v1003_v7 }
  0xb2   :  { %1036 = vmatprep.subr.bf16.mxu1 %v1035_v11 }
  0xb4   :  { %1006 = vmatpush3.bf16.msra.mxu0 %v1005_v17 }
  0xb5   :  { %1038 = vmatpush3.bf16.msra.mxu1 %v1037_v18  ;;  %1008 = vmatprep.subr.bf16.mxu0 %v1007_v20 }
  0xb6   :  { %1040 = vmatprep.subr.bf16.mxu1 %v1039_v21 }
  0xb8   :  { %1010 = vmatpush3.bf16.msra.mxu0 %v1009_v24 }
  0xb9   :  { %1042 = vmatpush3.bf16.msra.mxu1 %v1041_v26  ;;  %1012 = vmatprep.subr.bf16.mxu0 %v1011_v30 }
  0xba   :  { %1044 = vmatprep.subr.bf16.mxu1 %v1043_v34 }
  0xbc   :  { %1014 = vmatpush3.bf16.msra.mxu0 %v1013_v35 }
  0xbd   :  { %1046 = vmatpush3.bf16.msra.mxu1 %v1045_v38 }
 0x172   :  { %v432_v51 = vpop.f32.mrb[0].mxu0 }
 0x173   :  { %v530_v52 = vadd.f32 %v513_v46, %v432_v51  ;;  %v503_v53 = vpop.f32.mrb[0].mxu1  ;;  %v434_v54 = vpop.f32.mrb[1].mxu0 }
 0x174   :  { %v532_v55 = vadd.f32 %v521_v47, %v503_v53  ;;  %v531_v56 = vadd.f32 %v517_v49, %v434_v54  ;;  %v505_v57 = vpop.f32.mrb[1].mxu1 }
 0x175   :  { %v533_v58 = vadd.f32 %v525_v50, %v505_v57  ;;  %v534_v60 = vmax.f32 %v530_v52, 0.0 }
 0x176   :  { %v535_v59 = vmax.f32 %v531_v56, 0.0  ;;  %v536_v62 = vmax.f32 %v532_v55, 0.0 }
 0x177   :  { %v537_v61 = vmax.f32 %v533_v58, 0.0 }
 0x178   :  { %673 = vmatprep.mubr.f32.mxu0 %v535_v59 }
 0x179   :  { %743 = vmatprep.mubr.f32.mxu1 %v537_v61  ;;  %674 = vmatmul.mubr.f32.vlgmr.msra.gmra.mrb[2].mxu0 %v534_v60 }
 0x17a   :  { %744 = vmatmul.mubr.f32.vlgmr.msra.gmra.mrb[2].mxu1 %v536_v62 }
 0x24c   :  { %v817_v63 = vpop.f32.mrb[2].mxu0 }
 0x24d   :  { %v852_v1 = vpop.f32.mrb[2].mxu1  ;;  %v818_v3 = vpop.f32.mrb[3].mxu0 }
 0x24e   :  { %v819_v4 = vadd.f32 %v818_v3, %v817_v63  ;;  %v853_v5 = vpop.f32.mrb[3].mxu1 }
 0x24f   :  { %v854_v6 = vadd.f32 %v853_v5, %v852_v1 }
 0x250   :  { %v676_v7 = vadd.f32 %v819_v4, %v784_v2 }
 0x252   :  { %v746_v8 = vadd.f32 %v854_v6, %v676_v7 }
 0x254   :  { %v749_v9 = vadd.f32 %v746_v8, %v1358_v19  ;;  %v751_v10 = vadd.f32 %v746_v8, %v1352_v48 }
 0x256   :  { %750 = vst [vmem:[#allocation11] sm:$0xff] %v749_v9  ;;  %752 = vst [vmem:[#allocation12] sm:$0xff] %v751_v10 }
 0x257   :  { %1184 = shalt.err (!%p1181_p2)
}
 0x258   :  { %s1185_s1 = scalar_lea.hbm %s1401_s7, 128 }
 0x259   :  { %p1186_p3 = scmp.ne.s32.totalorder %s1401_s7, %s1185_s1  ;;  %p1189_p4 = scmp.lt.u32.totalorder %s1185_s1, %s1401_s7 }
 0x25b   :  { %p1191_p5 = pnand %p1189_p4, %p1186_p3 }
 0x25d   :  { %1194 = shalt.err (!%p1191_p5)
}
 0x25e   :  { %762 = dma.vmem_to_hbm [thread:$0]  %s760_s23, 128, %s1401_s7, [#allocation4]  }
 0x25f   :  { %s1195_s12 = scalar_lea.vmem %s770_s25, 128  ;;  %p1200_p7 = scmp.lt.s32.totalorder %s770_s25, %s770_s25 }
 0x260   :  { %p1196_p6 = scmp.ne.s32.totalorder %s770_s25, %s1195_s12  ;;  %p1201_p8 = scmp.lt.s32.totalorder %s1195_s12, %s1195_s12 }
 0x262   :  { %p1202_p9 = por %p1201_p8, %p1200_p7 }
 0x264   :  { %p1203_p10 = pnand %p1202_p9, %p1196_p6 }
 0x266   :  { %1206 = shalt.err (!%p1203_p10)
}
 0x267   :  { %s1207_s15 = scalar_lea.hbm %s1402_s8, 128 }
 0x268   :  { %p1208_p11 = scmp.ne.s32.totalorder %s1402_s8, %s1207_s15  ;;  %p1211_p12 = scmp.lt.u32.totalorder %s1207_s15, %s1402_s8 }
 0x26a   :  { %p1213_p13 = pnand %p1211_p12, %p1208_p11 }
 0x26c   :  { %1216 = shalt.err (!%p1213_p13)
}
 0x26d   :  { %772 = dma.vmem_to_hbm [thread:$0]  %s770_s25, 128, %s1402_s8, [#allocation13]  }
 0x26e   :  { %1223 = dma.done.wait [#allocation4], 128  }
 0x26f   :  { %1224 = vsyncadd [#allocation4], 4294967168 }
 0x270   :  { %1225 = dma.done.wait [#allocation13], 128  }
 0x271   :  { %1226 = vsyncadd [#allocation13], 4294967168 }
 0x272   :  { %779 = vsyncpa [#allocation3], 1 }
 0x273   :  { %780 = vsyncpa [#allocation6], 1 }
 0x274   :  { %781 = vsyncpa [#allocation9], 1 }
 0x275   :  { %782 = vsyncpa [#allocation4], 1 }
 0x276   :  { %783 = vsyncpa [#allocation13], 1 }

</bundles_post_ra>
